<compile_context>
chip_gen: v6e
topology: v6e:2x2x1
jax: 0.10.0
libtpu: 0.0.40
codegen_flags: <defaults>
</compile_context>

<pallas_src>
import functools

import jax
import jax.numpy as jnp
from jax import lax
from jax.experimental import pallas as pl
from jax.experimental.pallas import tpu as pltpu

K_NEIGHBORS = 3  # the torch module always interpolates from the 3 nearest points


# ---------------------------------------------------------------------------
# Fused kernel: one (batch, N-tile) slab per grid step.
# ---------------------------------------------------------------------------
def _fp_kernel(*refs, n_layers, has_points1):
    o_ref = refs[-1]
    x1 = refs[0][0]      # (C, TN)  f32 : dense point coords (lane axis = points)
    a2 = refs[1][0]      # (S, C)   f32 : -2 * xyz2^T
    x2sq = refs[2][0]    # (S, 1)   f32 : |xyz2|^2 per sampled point
    p2 = refs[3][0]      # (D2, S)  bf16: sampled-point features, channels-first
    i = 4
    p1 = None
    if has_points1:
        p1 = refs[i][0]  # (D1, TN) bf16: dense-point features, channels-first
        i += 1

    S = a2.shape[0]
    TN = x1.shape[1]

    # --- pairwise squared distances (f32 so top-3 selection stays exact) ----
    x1sq = jnp.sum(x1 * x1, axis=0, keepdims=True)                 # (1, TN)
    d = jnp.dot(a2, x1, preferred_element_type=jnp.float32)        # (S, TN)
    d = jnp.maximum(d + x2sq + x1sq, 0.0)   # clamp f32-cancellation negatives

    # --- 3 rounds of masked arg-min -> dense inverse-distance weights -------
    BIG = jnp.float32(1e30)
    s_iota = lax.broadcasted_iota(jnp.int32, (S, TN), 0).astype(jnp.float32)
    w_acc = jnp.zeros((S, TN), jnp.float32)
    norm = jnp.zeros((1, TN), jnp.float32)
    for _ in range(K_NEIGHBORS):
        mval = jnp.min(d, axis=0, keepdims=True)                   # (1, TN)
        sel = jnp.min(jnp.where(d == mval, s_iota, float(S)),
                      axis=0, keepdims=True)                       # first min idx
        hit = s_iota == sel                                        # one-hot / col
        recip = pl.reciprocal(mval + 1e-8, approx=True)            # EUP slot
        w_acc = w_acc + hit.astype(jnp.float32) * recip
        norm = norm + recip
        d = jnp.where(hit, BIG, d)
    w_sn = (w_acc * pl.reciprocal(norm, approx=True)).astype(jnp.bfloat16)

    # --- interpolation gather as one bf16 MXU matmul -------------------------
    interp = jnp.dot(p2, w_sn, preferred_element_type=jnp.float32)  # (D2, TN)
    interp = interp.astype(jnp.bfloat16)

    # --- Conv1d(k=1) + folded-BN + ReLU MLP (bf16 matmuls, f32 accumulate) ---
    # concat([points1, interp]) is realized as a split first-layer matmul.
    if has_points1:
        w0a = refs[i][...]; w0b = refs[i + 1][...]; b0 = refs[i + 2][...]
        i += 3
        z = (jnp.dot(w0a, p1, preferred_element_type=jnp.float32)
             + jnp.dot(w0b, interp, preferred_element_type=jnp.float32))
    else:
        w0 = refs[i][...]; b0 = refs[i + 1][...]
        i += 2
        z = jnp.dot(w0, interp, preferred_element_type=jnp.float32)
    h = jnp.maximum(z + b0, 0.0)

    for _ in range(1, n_layers):
        wl = refs[i][...]; bl = refs[i + 1][...]
        i += 2
        z = jnp.dot(wl, h.astype(jnp.bfloat16), preferred_element_type=jnp.float32)
        h = jnp.maximum(z + bl, 0.0)

    o_ref[0] = h.astype(o_ref.dtype)


# ---------------------------------------------------------------------------
# Wrapper
# ---------------------------------------------------------------------------
def pointnet_fp_forward(xyz1, xyz2, points1, points2, layers, *, tile_n=None):
    """
    xyz1:    (B, C, N)   dense point coords (channels-first, like the torch module)
    xyz2:    (B, C, S)   sampled point coords
    points1: (B, D1, N)  dense point features, or None
    points2: (B, D2, S)  sampled point features
    layers:  list of {"w": (C_out, C_in), "scale": (C_out,), "bias": (C_out,)}
             with eval-mode BatchNorm1d (+ Conv1d bias) folded into scale/bias.
    returns  (B, C_last, N) float32
    """
    xyz1 = xyz1.astype(jnp.float32)
    xyz2 = xyz2.astype(jnp.float32)
    points2 = points2.astype(jnp.float32)
    B, C, N = xyz1.shape
    S = xyz2.shape[2]
    D2 = points2.shape[1]
    has_points1 = points1 is not None
    D1 = points1.shape[1] if has_points1 else 0
    n_layers = len(layers)
    channels = [int(lay["w"].shape[0]) for lay in layers]
    c_last = channels[-1]

    if S == 1:
        # torch branch `interpolated = points2.repeat(1, N, 1)`: replicating the
        # single sample 4x makes the generic 3-NN path return exactly that
        # broadcast (equal distances -> weights summing to 1 on identical features).
        xyz2 = jnp.concatenate([xyz2] * 4, axis=2)
        points2 = jnp.concatenate([points2] * 4, axis=2)
        S = 4
    assert S >= K_NEIGHBORS, "feature propagation needs S >= 3 sampled points"

    # Lane padding: keep the point axis a multiple of 128 (lane-dense stores,
    # enables tiling / megacore sharding).  Padded lanes are sliced off at the end.
    N_pad = ((N + 127) // 128) * 128
    if N_pad != N:
        xyz1 = jnp.pad(xyz1, ((0, 0), (0, 0), (0, N_pad - N)))
        if has_points1:
            points1 = jnp.pad(points1, ((0, 0), (0, 0), (0, N_pad - N)))

    # Small sampled-point operands (distance path stays f32 inside the kernel).
    a2 = -2.0 * jnp.transpose(xyz2, (0, 2, 1))                # (B, S, C)
    x2sq = jnp.sum(xyz2 * xyz2, axis=1)[:, :, None]           # (B, S, 1)

    # Feature / MLP path in bf16 (f32 accumulation inside the kernel).
    p2_bf = points2.astype(jnp.bfloat16)
    p1_bf = points1.astype(jnp.bfloat16) if has_points1 else None

    # --- tile selection under an explicit VMEM budget (v7x: 64 MiB total) ----
    VMEM_BUDGET = 40 * 1024 * 1024

    def _vmem_est(tn):
        cmax = max(channels + [D1 + D2])
        b = 2 * C * tn * 4                       # xyz1 tile, double-buffered
        if has_points1:
            b += 2 * D1 * tn * 2                 # points1 tile (bf16)
        b += 2 * c_last * tn * 4                 # output tile
        b += 6 * S * tn * 4                      # d / hit / w_acc / w_sn / iota
        b += 4 * cmax * tn * 4                   # widest activations / staging
        b += 2 * 1024 * 1024                     # weights + slack
        return b

    if tile_n is None:
        cands = [t for t in (1024, 512, 256, 128)
                 if N_pad % t == 0 and _vmem_est(t) <= VMEM_BUDGET]
        if not cands:
            cands = [128]
        # prefer >= 2 grid steps along N (megacore / v7x two-TC sharding)
        tile_n = next((t for t in cands if N_pad // t >= 2), cands[-1])
    assert N_pad % tile_n == 0, "padded N must be divisible by tile_n"
    grid = (B, N_pad // tile_n)

    cp_kwargs = dict(dimension_semantics=("parallel", "parallel"))
    est_bytes = _vmem_est(tile_n)
    if tile_n >= 512 or est_bytes > 16 * 1024 * 1024:
        cp_kwargs["vmem_limit_bytes"] = int(
            min(48 * 1024 * 1024, max(2 * est_bytes, 32 * 1024 * 1024)))

    inputs = [xyz1, a2, x2sq, p2_bf]
    in_specs = [
        pl.BlockSpec((1, C, tile_n), lambda b, j: (b, 0, j)),
        pl.BlockSpec((1, S, C), lambda b, j: (b, 0, 0)),
        pl.BlockSpec((1, S, 1), lambda b, j: (b, 0, 0)),
        pl.BlockSpec((1, D2, S), lambda b, j: (b, 0, 0)),
    ]
    if has_points1:
        inputs.append(p1_bf)
        in_specs.append(pl.BlockSpec((1, D1, tile_n), lambda b, j: (b, 0, j)))

    def _full2d(arr):
        return pl.BlockSpec(arr.shape, lambda b, j: (0, 0))

    for li, lay in enumerate(layers):
        w = lay["w"].astype(jnp.float32)
        s = lay["scale"].astype(jnp.float32).reshape(-1, 1)
        bb = lay["bias"].astype(jnp.float32).reshape(-1, 1)
        w_bf = (s * w).astype(jnp.bfloat16)     # fold BN scale into the weights
        if li == 0 and has_points1:
            assert w.shape[1] == D1 + D2, "first-layer in_channel must be D1 + D2"
            wa, wb = w_bf[:, :D1], w_bf[:, D1:]
            inputs += [wa, wb, bb]
            in_specs += [_full2d(wa), _full2d(wb), _full2d(bb)]
        else:
            inputs += [w_bf, bb]
            in_specs += [_full2d(w_bf), _full2d(bb)]

    kernel = functools.partial(_fp_kernel, n_layers=n_layers,
                               has_points1=has_points1)
    out = pl.pallas_call(
        kernel,
        out_shape=jax.ShapeDtypeStruct((B, c_last, N_pad), jnp.float32),
        grid=grid,
        in_specs=in_specs,
        out_specs=pl.BlockSpec((1, c_last, tile_n), lambda b, j: (b, 0, j)),
        compiler_params=pltpu.CompilerParams(**cp_kwargs),
    )(*inputs)
    if N_pad != N:
        out = out[:, :, :N]
    return out


# ---------------------------------------------------------------------------
# Pure-JAX reference (mirrors the torch forward), for correctness checking.
# ---------------------------------------------------------------------------
def pointnet_fp_reference(xyz1, xyz2, points1, points2, layers):
    x1 = jnp.transpose(xyz1, (0, 2, 1))        # (B, N, C)
    x2 = jnp.transpose(xyz2, (0, 2, 1))        # (B, S, C)
    p2 = jnp.transpose(points2, (0, 2, 1))     # (B, S, D2)
    B, N, _ = x1.shape
    S = x2.shape[1]
    if S == 1:
        interp = jnp.tile(p2, (1, N, 1))
    else:
        cross = jnp.einsum("bnc,bsc->bns", x1, x2,
                           precision=lax.Precision.HIGHEST)
        d = (-2.0 * cross
             + jnp.sum(x1 ** 2, -1)[:, :, None]
             + jnp.sum(x2 ** 2, -1)[:, None, :])                     # (B, N, S)
        idx = jnp.argsort(d, axis=-1)[:, :, :3]                      # (B, N, 3)
        dk = jnp.take_along_axis(d, idx, axis=-1)
        recip = 1.0 / (dk + 1e-8)
        w = recip / jnp.sum(recip, axis=-1, keepdims=True)
        gathered = jax.vmap(lambda p, i: p[i])(p2, idx)              # (B, N, 3, D2)
        interp = jnp.sum(gathered * w[..., None], axis=2)            # (B, N, D2)
    if points1 is not None:
        h = jnp.concatenate([jnp.transpose(points1, (0, 2, 1)), interp], axis=-1)
    else:
        h = interp
    h = jnp.transpose(h, (0, 2, 1))                                  # (B, Cin, N)
    for lay in layers:
        z = jnp.einsum("oc,bcn->bon", lay["w"], h,
                       precision=lax.Precision.HIGHEST)
        h = jnp.maximum(z * lay["scale"][None, :, None]
                        + lay["bias"][None, :, None], 0.0)
    return h


if __name__ == "__main__":
    B, N, S = 2, 256, 8
    D1, D2 = 16, 32
    mlp = [64, 32]
    in_channel = D1 + D2

    key = jax.random.PRNGKey(0)
    ks = jax.random.split(key, 4 + 6 * len(mlp))
    xyz1 = jax.random.normal(ks[0], (B, 3, N), jnp.float32)
    xyz2 = jax.random.normal(ks[1], (B, 3, S), jnp.float32)
    points1 = jax.random.normal(ks[2], (B, D1, N), jnp.float32)
    points2 = jax.random.normal(ks[3], (B, D2, S), jnp.float32)

    # Conv1d(k=1) weights (Cout, Cin), conv bias and BatchNorm1d (eval) params,
    # folded into per-channel scale / bias.
    layers = []
    c_in = in_channel
    kidx = 4
    for c_out in mlp:
        w = 0.2 * jax.random.normal(ks[kidx], (c_out, c_in), jnp.float32); kidx += 1
        cb = 0.1 * jax.random.normal(ks[kidx], (c_out,), jnp.float32); kidx += 1
        gamma = jax.random.uniform(ks[kidx], (c_out,), jnp.float32, 0.5, 1.5); kidx += 1
        beta = 0.1 * jax.random.normal(ks[kidx], (c_out,), jnp.float32); kidx += 1
        mean = 0.1 * jax.random.normal(ks[kidx], (c_out,), jnp.float32); kidx += 1
        var = jax.random.uniform(ks[kidx], (c_out,), jnp.float32, 0.5, 1.5); kidx += 1
        scale = gamma / jnp.sqrt(var + 1e-5)
        bias = beta - mean * scale + scale * cb     # BN(conv(x)+cb) folded
        layers.append({"w": w, "scale": scale, "bias": bias})
        c_in = c_out

    out = pointnet_fp_forward(xyz1, xyz2, points1, points2, layers)
    out = jax.block_until_ready(out)

    ref = pointnet_fp_reference(xyz1, xyz2, points1, points2, layers)
    ref = jax.block_until_ready(ref)

    assert out.shape == (B, mlp[-1], N), out.shape
    # bf16 compute (f32 accumulate) in the kernel vs f32 HIGHEST-precision
    # reference -> bf16-appropriate tolerance.
    if not jnp.allclose(out, ref, atol=8e-2, rtol=8e-2):
        max_err = float(jnp.max(jnp.abs(out - ref)))
        raise AssertionError(
            f"Pallas PointNetFeaturePropagation mismatch vs reference, max_err={max_err}")

    print("KERNEL_OK")
</pallas_src>

<mosaic_0001>
module attributes {stable_mosaic.version = 11 : i64} {
  func.func @_fp_kernel(%arg0: i32, %arg1: i32, %arg2: memref<1x3x128xf32, #tpu.memory_space<vmem>>, %arg3: memref<1x8x3xf32, #tpu.memory_space<vmem>>, %arg4: memref<1x8x1xf32, #tpu.memory_space<vmem>>, %arg5: memref<1x32x8xbf16, #tpu.memory_space<vmem>>, %arg6: memref<1x16x128xbf16, #tpu.memory_space<vmem>>, %arg7: memref<64x16xbf16, #tpu.memory_space<vmem>>, %arg8: memref<64x32xbf16, #tpu.memory_space<vmem>>, %arg9: memref<64x1xf32, #tpu.memory_space<vmem>>, %arg10: memref<32x64xbf16, #tpu.memory_space<vmem>>, %arg11: memref<32x1xf32, #tpu.memory_space<vmem>>, %arg12: memref<1x32x128xf32, #tpu.memory_space<vmem>>) attributes {dimension_semantics = [#tpu.dimension_semantics<parallel>, #tpu.dimension_semantics<parallel>], iteration_bounds = array<i64: 2, 2>, scalar_prefetch = 0 : i64, scratch_operands = 0 : i64, tpu.core_type = #tpu.core_type<tc>, window_params = [{transform_indices = @transform_0, window_bounds = array<i64: 1, 3, 128>}, {transform_indices = @transform_1, window_bounds = array<i64: 1, 8, 3>}, {transform_indices = @transform_2, window_bounds = array<i64: 1, 8, 1>}, {transform_indices = @transform_3, window_bounds = array<i64: 1, 32, 8>}, {transform_indices = @transform_4, window_bounds = array<i64: 1, 16, 128>}, {pipeline_mode = #tpu.pipeline_mode<synchronous>, transform_indices = @transform_5, window_bounds = array<i64: 64, 16>}, {pipeline_mode = #tpu.pipeline_mode<synchronous>, transform_indices = @transform_6, window_bounds = array<i64: 64, 32>}, {pipeline_mode = #tpu.pipeline_mode<synchronous>, transform_indices = @transform_7, window_bounds = array<i64: 64, 1>}, {pipeline_mode = #tpu.pipeline_mode<synchronous>, transform_indices = @transform_8, window_bounds = array<i64: 32, 64>}, {pipeline_mode = #tpu.pipeline_mode<synchronous>, transform_indices = @transform_9, window_bounds = array<i64: 32, 1>}, {transform_indices = @transform_10, window_bounds = array<i64: 1, 32, 128>}]} {
    %c0 = arith.constant 0 : index
    %c0_0 = arith.constant 0 : index
    %c0_1 = arith.constant 0 : index
    %0 = vector.load %arg2[%c0, %c0_0, %c0_1] : memref<1x3x128xf32, #tpu.memory_space<vmem>>, vector<1x3x128xf32>
    %1 = vector.shape_cast %0 : vector<1x3x128xf32> to vector<3x128xf32>
    %c0_2 = arith.constant 0 : index
    %c0_3 = arith.constant 0 : index
    %c0_4 = arith.constant 0 : index
    %2 = vector.load %arg3[%c0_2, %c0_3, %c0_4] : memref<1x8x3xf32, #tpu.memory_space<vmem>>, vector<1x8x3xf32>
    %3 = vector.shape_cast %2 : vector<1x8x3xf32> to vector<8x3xf32>
    %c0_5 = arith.constant 0 : index
    %c0_6 = arith.constant 0 : index
    %c0_7 = arith.constant 0 : index
    %4 = vector.load %arg4[%c0_5, %c0_6, %c0_7] : memref<1x8x1xf32, #tpu.memory_space<vmem>>, vector<1x8x1xf32>
    %5 = vector.shape_cast %4 : vector<1x8x1xf32> to vector<8x1xf32>
    %c0_8 = arith.constant 0 : index
    %c0_9 = arith.constant 0 : index
    %c0_10 = arith.constant 0 : index
    %6 = vector.load %arg5[%c0_8, %c0_9, %c0_10] : memref<1x32x8xbf16, #tpu.memory_space<vmem>>, vector<1x32x8xbf16>
    %7 = vector.shape_cast %6 : vector<1x32x8xbf16> to vector<32x8xbf16>
    %c0_11 = arith.constant 0 : index
    %c0_12 = arith.constant 0 : index
    %c0_13 = arith.constant 0 : index
    %8 = vector.load %arg6[%c0_11, %c0_12, %c0_13] : memref<1x16x128xbf16, #tpu.memory_space<vmem>>, vector<1x16x128xbf16>
    %9 = vector.shape_cast %8 : vector<1x16x128xbf16> to vector<16x128xbf16>
    %10 = arith.mulf %1, %1 : vector<3x128xf32>
    %cst = arith.constant dense<0.000000e+00> : vector<128xf32>
    %11 = vector.multi_reduction <add>, %10, %cst [0] : vector<3x128xf32> to vector<128xf32>
    %12 = vector.shape_cast %11 : vector<128xf32> to vector<1x128xf32>
    %cst_14 = arith.constant dense<0.000000e+00> : vector<8x128xf32>
    %13 = tpu.matmul %3, %1, %cst_14 {dimension_numbers = #tpu.dot_dimension_numbers<[1], [0], [0], [1], [0, 0, 1, 1], [], []>} : vector<8x3xf32>, vector<3x128xf32>, vector<8x128xf32> -> vector<8x128xf32>
    %14 = vector.broadcast %5 : vector<8x1xf32> to vector<8x128xf32>
    %15 = arith.addf %13, %14 : vector<8x128xf32>
    %16 = vector.broadcast %12 : vector<1x128xf32> to vector<8x128xf32>
    %17 = arith.addf %15, %16 : vector<8x128xf32>
    %cst_15 = arith.constant 0.000000e+00 : f32
    %18 = vector.broadcast %cst_15 : f32 to vector<8x128xf32>
    %19 = arith.maximumf %17, %18 : vector<8x128xf32>
    %20 = tpu.iota {dimensions = array<i32: 0>} : vector<8x128xi32>
    %21 = arith.sitofp %20 : vector<8x128xi32> to vector<8x128xf32>
    %cst_16 = arith.constant 0.000000e+00 : f32
    %22 = vector.broadcast %cst_16 : f32 to vector<8x128xf32>
    %cst_17 = arith.constant 0.000000e+00 : f32
    %23 = vector.broadcast %cst_17 : f32 to vector<1x128xf32>
    %cst_18 = arith.constant dense<0x7F800000> : vector<128xf32>
    %24 = vector.multi_reduction <minimumf>, %19, %cst_18 [0] : vector<8x128xf32> to vector<128xf32>
    %25 = vector.shape_cast %24 : vector<128xf32> to vector<1x128xf32>
    %26 = vector.broadcast %25 : vector<1x128xf32> to vector<8x128xf32>
    %27 = arith.cmpf oeq, %19, %26 : vector<8x128xf32>
    %cst_19 = arith.constant 8.000000e+00 : f32
    %28 = vector.broadcast %cst_19 : f32 to vector<8x128xf32>
    %29 = arith.select %27, %21, %28 : vector<8x128xi1>, vector<8x128xf32>
    %cst_20 = arith.constant dense<0x7F800000> : vector<128xf32>
    %30 = vector.multi_reduction <minimumf>, %29, %cst_20 [0] : vector<8x128xf32> to vector<128xf32>
    %31 = vector.shape_cast %30 : vector<128xf32> to vector<1x128xf32>
    %32 = vector.broadcast %31 : vector<1x128xf32> to vector<8x128xf32>
    %33 = arith.cmpf oeq, %21, %32 : vector<8x128xf32>
    %cst_21 = arith.constant 9.99999993E-9 : f32
    %34 = vector.broadcast %cst_21 : f32 to vector<1x128xf32>
    %35 = arith.addf %25, %34 : vector<1x128xf32>
    %36 = tpu.reciprocal %35 {approx = true} : vector<1x128xf32> -> vector<1x128xf32>
    %37 = arith.extui %33 : vector<8x128xi1> to vector<8x128xi32>
    %38 = arith.sitofp %37 : vector<8x128xi32> to vector<8x128xf32>
    %39 = vector.broadcast %36 : vector<1x128xf32> to vector<8x128xf32>
    %40 = arith.mulf %38, %39 : vector<8x128xf32>
    %41 = arith.addf %22, %40 : vector<8x128xf32>
    %42 = arith.addf %23, %36 : vector<1x128xf32>
    %cst_22 = arith.constant 1.000000e+30 : f32
    %43 = vector.broadcast %cst_22 : f32 to vector<8x128xf32>
    %44 = arith.select %33, %43, %19 : vector<8x128xi1>, vector<8x128xf32>
    %cst_23 = arith.constant dense<0x7F800000> : vector<128xf32>
    %45 = vector.multi_reduction <minimumf>, %44, %cst_23 [0] : vector<8x128xf32> to vector<128xf32>
    %46 = vector.shape_cast %45 : vector<128xf32> to vector<1x128xf32>
    %47 = vector.broadcast %46 : vector<1x128xf32> to vector<8x128xf32>
    %48 = arith.cmpf oeq, %44, %47 : vector<8x128xf32>
    %cst_24 = arith.constant 8.000000e+00 : f32
    %49 = vector.broadcast %cst_24 : f32 to vector<8x128xf32>
    %50 = arith.select %48, %21, %49 : vector<8x128xi1>, vector<8x128xf32>
    %cst_25 = arith.constant dense<0x7F800000> : vector<128xf32>
    %51 = vector.multi_reduction <minimumf>, %50, %cst_25 [0] : vector<8x128xf32> to vector<128xf32>
    %52 = vector.shape_cast %51 : vector<128xf32> to vector<1x128xf32>
    %53 = vector.broadcast %52 : vector<1x128xf32> to vector<8x128xf32>
    %54 = arith.cmpf oeq, %21, %53 : vector<8x128xf32>
    %cst_26 = arith.constant 9.99999993E-9 : f32
    %55 = vector.broadcast %cst_26 : f32 to vector<1x128xf32>
    %56 = arith.addf %46, %55 : vector<1x128xf32>
    %57 = tpu.reciprocal %56 {approx = true} : vector<1x128xf32> -> vector<1x128xf32>
    %58 = arith.extui %54 : vector<8x128xi1> to vector<8x128xi32>
    %59 = arith.sitofp %58 : vector<8x128xi32> to vector<8x128xf32>
    %60 = vector.broadcast %57 : vector<1x128xf32> to vector<8x128xf32>
    %61 = arith.mulf %59, %60 : vector<8x128xf32>
    %62 = arith.addf %41, %61 : vector<8x128xf32>
    %63 = arith.addf %42, %57 : vector<1x128xf32>
    %cst_27 = arith.constant 1.000000e+30 : f32
    %64 = vector.broadcast %cst_27 : f32 to vector<8x128xf32>
    %65 = arith.select %54, %64, %44 : vector<8x128xi1>, vector<8x128xf32>
    %cst_28 = arith.constant dense<0x7F800000> : vector<128xf32>
    %66 = vector.multi_reduction <minimumf>, %65, %cst_28 [0] : vector<8x128xf32> to vector<128xf32>
    %67 = vector.shape_cast %66 : vector<128xf32> to vector<1x128xf32>
    %68 = vector.broadcast %67 : vector<1x128xf32> to vector<8x128xf32>
    %69 = arith.cmpf oeq, %65, %68 : vector<8x128xf32>
    %cst_29 = arith.constant 8.000000e+00 : f32
    %70 = vector.broadcast %cst_29 : f32 to vector<8x128xf32>
    %71 = arith.select %69, %21, %70 : vector<8x128xi1>, vector<8x128xf32>
    %cst_30 = arith.constant dense<0x7F800000> : vector<128xf32>
    %72 = vector.multi_reduction <minimumf>, %71, %cst_30 [0] : vector<8x128xf32> to vector<128xf32>
    %73 = vector.shape_cast %72 : vector<128xf32> to vector<1x128xf32>
    %74 = vector.broadcast %73 : vector<1x128xf32> to vector<8x128xf32>
    %75 = arith.cmpf oeq, %21, %74 : vector<8x128xf32>
    %cst_31 = arith.constant 9.99999993E-9 : f32
    %76 = vector.broadcast %cst_31 : f32 to vector<1x128xf32>
    %77 = arith.addf %67, %76 : vector<1x128xf32>
    %78 = tpu.reciprocal %77 {approx = true} : vector<1x128xf32> -> vector<1x128xf32>
    %79 = arith.extui %75 : vector<8x128xi1> to vector<8x128xi32>
    %80 = arith.sitofp %79 : vector<8x128xi32> to vector<8x128xf32>
    %81 = vector.broadcast %78 : vector<1x128xf32> to vector<8x128xf32>
    %82 = arith.mulf %80, %81 : vector<8x128xf32>
    %83 = arith.addf %62, %82 : vector<8x128xf32>
    %84 = arith.addf %63, %78 : vector<1x128xf32>
    %85 = tpu.reciprocal %84 {approx = true} : vector<1x128xf32> -> vector<1x128xf32>
    %86 = vector.broadcast %85 : vector<1x128xf32> to vector<8x128xf32>
    %87 = arith.mulf %83, %86 : vector<8x128xf32>
    %88 = arith.truncf %87 : vector<8x128xf32> to vector<8x128xbf16>
    %cst_32 = arith.constant dense<0.000000e+00> : vector<32x128xf32>
    %89 = tpu.matmul %7, %88, %cst_32 {dimension_numbers = #tpu.dot_dimension_numbers<[1], [0], [0], [1], [0, 0, 1, 1], [], []>} : vector<32x8xbf16>, vector<8x128xbf16>, vector<32x128xf32> -> vector<32x128xf32>
    %90 = arith.truncf %89 : vector<32x128xf32> to vector<32x128xbf16>
    %c0_33 = arith.constant 0 : index
    %c0_34 = arith.constant 0 : index
    %91 = vector.load %arg7[%c0_33, %c0_34] : memref<64x16xbf16, #tpu.memory_space<vmem>>, vector<64x16xbf16>
    %c0_35 = arith.constant 0 : index
    %c0_36 = arith.constant 0 : index
    %92 = vector.load %arg8[%c0_35, %c0_36] : memref<64x32xbf16, #tpu.memory_space<vmem>>, vector<64x32xbf16>
    %c0_37 = arith.constant 0 : index
    %c0_38 = arith.constant 0 : index
    %93 = vector.load %arg9[%c0_37, %c0_38] : memref<64x1xf32, #tpu.memory_space<vmem>>, vector<64x1xf32>
    %cst_39 = arith.constant dense<0.000000e+00> : vector<64x128xf32>
    %94 = tpu.matmul %91, %9, %cst_39 {dimension_numbers = #tpu.dot_dimension_numbers<[1], [0], [0], [1], [0, 0, 1, 1], [], []>} : vector<64x16xbf16>, vector<16x128xbf16>, vector<64x128xf32> -> vector<64x128xf32>
    %cst_40 = arith.constant dense<0.000000e+00> : vector<64x128xf32>
    %95 = tpu.matmul %92, %90, %cst_40 {dimension_numbers = #tpu.dot_dimension_numbers<[1], [0], [0], [1], [0, 0, 1, 1], [], []>} : vector<64x32xbf16>, vector<32x128xbf16>, vector<64x128xf32> -> vector<64x128xf32>
    %96 = arith.addf %94, %95 : vector<64x128xf32>
    %97 = vector.broadcast %93 : vector<64x1xf32> to vector<64x128xf32>
    %98 = arith.addf %96, %97 : vector<64x128xf32>
    %cst_41 = arith.constant 0.000000e+00 : f32
    %99 = vector.broadcast %cst_41 : f32 to vector<64x128xf32>
    %100 = arith.maximumf %98, %99 : vector<64x128xf32>
    %c0_42 = arith.constant 0 : index
    %c0_43 = arith.constant 0 : index
    %101 = vector.load %arg10[%c0_42, %c0_43] : memref<32x64xbf16, #tpu.memory_space<vmem>>, vector<32x64xbf16>
    %c0_44 = arith.constant 0 : index
    %c0_45 = arith.constant 0 : index
    %102 = vector.load %arg11[%c0_44, %c0_45] : memref<32x1xf32, #tpu.memory_space<vmem>>, vector<32x1xf32>
    %103 = arith.truncf %100 : vector<64x128xf32> to vector<64x128xbf16>
    %cst_46 = arith.constant dense<0.000000e+00> : vector<32x128xf32>
    %104 = tpu.matmul %101, %103, %cst_46 {dimension_numbers = #tpu.dot_dimension_numbers<[1], [0], [0], [1], [0, 0, 1, 1], [], []>} : vector<32x64xbf16>, vector<64x128xbf16>, vector<32x128xf32> -> vector<32x128xf32>
    %105 = vector.broadcast %102 : vector<32x1xf32> to vector<32x128xf32>
    %106 = arith.addf %104, %105 : vector<32x128xf32>
    %cst_47 = arith.constant 0.000000e+00 : f32
    %107 = vector.broadcast %cst_47 : f32 to vector<32x128xf32>
    %108 = arith.maximumf %106, %107 : vector<32x128xf32>
    %c0_48 = arith.constant 0 : index
    %c0_49 = arith.constant 0 : index
    %c0_50 = arith.constant 0 : index
    %109 = vector.load %arg12[%c0_48, %c0_49, %c0_50] : memref<1x32x128xf32, #tpu.memory_space<vmem>>, vector<1x32x128xf32>
    %110 = vector.shape_cast %109 : vector<1x32x128xf32> to vector<32x128xf32>
    %111 = vector.shape_cast %108 : vector<32x128xf32> to vector<1x32x128xf32>
    tpu.vector_store %arg12[%c0_48, %c0_49, %c0_50], %111 {strides = array<i32>} : memref<1x32x128xf32, #tpu.memory_space<vmem>>, vector<1x32x128xf32>,
    return
  }
  func.func @transform_0(%arg0: i32, %arg1: i32) -> (i32, i32, i32) {
    %c0_i32 = arith.constant 0 : i32
    %c0_i32_0 = arith.constant 0 : i32
    return %arg0, %c0_i32, %arg1 : i32, i32, i32
  }
  func.func @transform_1(%arg0: i32, %arg1: i32) -> (i32, i32, i32) {
    %c0_i32 = arith.constant 0 : i32
    %c0_i32_0 = arith.constant 0 : i32
    %c0_i32_1 = arith.constant 0 : i32
    return %arg0, %c0_i32, %c0_i32_0 : i32, i32, i32
  }
  func.func @transform_2(%arg0: i32, %arg1: i32) -> (i32, i32, i32) {
    %c0_i32 = arith.constant 0 : i32
    %c0_i32_0 = arith.constant 0 : i32
    %c0_i32_1 = arith.constant 0 : i32
    return %arg0, %c0_i32, %c0_i32_0 : i32, i32, i32
  }
  func.func @transform_3(%arg0: i32, %arg1: i32) -> (i32, i32, i32) {
    %c0_i32 = arith.constant 0 : i32
    %c0_i32_0 = arith.constant 0 : i32
    %c0_i32_1 = arith.constant 0 : i32
    return %arg0, %c0_i32, %c0_i32_0 : i32, i32, i32
  }
  func.func @transform_4(%arg0: i32, %arg1: i32) -> (i32, i32, i32) {
    %c0_i32 = arith.constant 0 : i32
    %c0_i32_0 = arith.constant 0 : i32
    return %arg0, %c0_i32, %arg1 : i32, i32, i32
  }
  func.func @transform_5(%arg0: i32, %arg1: i32) -> (i32, i32) {
    %c0_i32 = arith.constant 0 : i32
    %c0_i32_0 = arith.constant 0 : i32
    %c0_i32_1 = arith.constant 0 : i32
    return %c0_i32, %c0_i32_0 : i32, i32
  }
  func.func @transform_6(%arg0: i32, %arg1: i32) -> (i32, i32) {
    %c0_i32 = arith.constant 0 : i32
    %c0_i32_0 = arith.constant 0 : i32
    %c0_i32_1 = arith.constant 0 : i32
    return %c0_i32, %c0_i32_0 : i32, i32
  }
  func.func @transform_7(%arg0: i32, %arg1: i32) -> (i32, i32) {
    %c0_i32 = arith.constant 0 : i32
    %c0_i32_0 = arith.constant 0 : i32
    %c0_i32_1 = arith.constant 0 : i32
    return %c0_i32, %c0_i32_0 : i32, i32
  }
  func.func @transform_8(%arg0: i32, %arg1: i32) -> (i32, i32) {
    %c0_i32 = arith.constant 0 : i32
    %c0_i32_0 = arith.constant 0 : i32
    %c0_i32_1 = arith.constant 0 : i32
    return %c0_i32, %c0_i32_0 : i32, i32
  }
  func.func @transform_9(%arg0: i32, %arg1: i32) -> (i32, i32) {
    %c0_i32 = arith.constant 0 : i32
    %c0_i32_0 = arith.constant 0 : i32
    %c0_i32_1 = arith.constant 0 : i32
    return %c0_i32, %c0_i32_0 : i32, i32
  }
  func.func @transform_10(%arg0: i32, %arg1: i32) -> (i32, i32, i32) {
    %c0_i32 = arith.constant 0 : i32
    %c0_i32_0 = arith.constant 0 : i32
    return %arg0, %c0_i32, %arg1 : i32, i32, i32
  }
}

</mosaic_0001>

<bundles_post_ra>
// kernel: tpu_custom_call.1
= control target key start
LH: loop header
LB: loop body
LE: loop exit
PB: predicated region body
PF: predicated region fallthrough
CT: control target
= control target key end

     0   :  { %s1927_s0 = inlined_call_operand.vmem [shape: f32[2,3,256], index: 0, kind: input, shape index: {}]   ;;  %s1928_s1 = inlined_call_operand.vmem [shape: f32[2,8,3], index: 1, kind: input, shape index: {}]   ;;  %s1929_s2 = inlined_call_operand.vmem [shape: f32[2,8,1], index: 2, kind: input, shape index: {}]   ;;  %s1930_s3 = inlined_call_operand.vmem [shape: bf16[2,32,8], index: 3, kind: input, shape index: {}]   ;;  %s1931_s4 = inlined_call_operand.vmem [shape: bf16[2,16,256], index: 4, kind: input, shape index: {}]   ;;  %s1932_s5 = inlined_call_operand.vmem [shape: bf16[64,16], index: 5, kind: input, shape index: {}]   ;;  %s1933_s6 = inlined_call_operand.vmem [shape: bf16[64,32], index: 6, kind: input, shape index: {}]   ;;  %s1934_s7 = inlined_call_operand.vmem [shape: f32[64,1], index: 7, kind: input, shape index: {}]   ;;  %s1935_s8 = inlined_call_operand.vmem [shape: bf16[32,64], index: 8, kind: input, shape index: {}]   ;;  %s1936_s9 = inlined_call_operand.vmem [shape: f32[32,1], index: 9, kind: input, shape index: {}]   ;;  %s1937_s10 = inlined_call_operand.hbm [shape: f32[2,32,256], index: 10, kind: output, shape index: {}]  }
   0x1   :  { %1944 = sst [smem:[#allocation13_spill]] %s1931_s4 }
   0x2   :  { %15 = vsyncpa [#allocation4], 0 }
   0x3   :  { %17 = vsyncpa [#allocation4 + $0x1], 0  ;;  %s1673_s13 = smov 0   ;;  %s1675_s14 = smov 0  }
   0x4   :  { %s1677_s15 = smov 0   ;;  %s1679_s16 = smov 0  }
   0x5   :  { %s1681_s17 = smov 0   ;;  %s1683_s18 = smov 0  }
   0x6   :  { %s1685_s19 = smov 0   ;;  %s1687_s20 = smov 0  }
   0x7 LB: > { %1945 = sst [smem:[#allocation6_spill]] %s1581_s13  ;;  %s1297_s21 = sadd.s32 4294967295, %s1609_s20   ;;  %s1609_s20 = sphi %s1687_s20, %s23_s20   ;;  %s1605_s19 = sphi %s1685_s19, %s1962_s19   ;;  %s1601_s18 = sphi %s1683_s18, %s1961_s18   ;;  %s1597_s17 = sphi %s1681_s17, %s1960_s17   ;;  %s1593_s16 = sphi %s1679_s16, %s1959_s16   ;;  %s1589_s15 = sphi %s1677_s15, %s1965_s15   ;;  %s1585_s14 = sphi %s1675_s14, %s1964_s14   ;;  %s1581_s13 = sphi %s1673_s13, %s1963_s13  }
   0x8   : > { %1946 = sst [smem:[#allocation7_spill]] %s1601_s18  ;;  %s1298_s22 = sadd.s32 4294967294, %s1609_s20  }
   0x9   : > { %1947 = sst [smem:[#allocation8_spill]] %s1605_s19  ;;  %s32_s23 = sadd.s32 1, %s1601_s18 }
   0xa   : > { %p33_p0 = scmp.ge.s32.totalorder %s32_s23, 2  ;;  %s35_s24 = sadd.s32 1, %s1605_s19 }
   0xb   : > { %p157_p1 = scmp.ne.s32.totalorder %s1589_s15, %s1585_s14  ;;  %p158_p2 = scmp.eq.s32.totalorder %s1609_s20, 0 }
   0xc   : > { %s1967_s23 = smov (%p33_p0, %s32_s23), 0  ;;  %s1969_s24 = smov (!%p33_p0, %s35_s24), %s1605_s19 }
   0xd   : > { %1948 = sst [smem:[#allocation9_spill]] %s1967_s23  ;;  %s146_s25 = ssub.s32 %s1601_s18, %s1967_s23 }
   0xe   : > { %p1725_p3 = por %p158_p2, %p157_p1  ;;  %p37_p4 = scmp.ge.s32.totalorder %s1969_s24, 2 }
   0xf   : > { %p294_p5 = scmp.eq.s32.totalorder %s1297_s21, 3  ;;  %p299_p6 = scmp.ne.s32.totalorder %s1585_s14, %s1581_s13 }
  0x10   : > { %p300_p7 = scmp.eq.s32.totalorder %s1298_s22, 3  ;;  %s1971_s24 = smov (%p37_p4, %s1969_s24), 0 }
  0x11   : > { %1950 = sst [smem:[#allocation10_spill]] %s1971_s24  ;;  %p1733_p8 = por %p294_p5, %p157_p1 }
  0x12   : > { %p1737_p9 = por %p300_p7, %p299_p6  ;;  %s145_s29 = ssub.s32 %s1605_s19, %s1971_s24 }
  0x13   : > { %s147_s30 = sor.u32 %s146_s25, %s145_s29  ;;  %s150_s11 = sadd.s32 1, %s1589_s15 }
  0x14   : > { %s1952_s28 = scalar_select %p1737_p9, 1, 0 }
  0x15   : > { %p148_p10 = scmp.eq.s32.totalorder %s147_s30, 0  ;;  %p1300_p11 = scmp.ge.s32.totalorder %s1609_s20, 4 }
  0x16   : > { %1953 = sst [smem:[#allocation11_spill]] %s1952_s28 }
  0x17   : > { %s1745_s12 = scalar_select %p148_p10, %s1589_s15, %s150_s11  }
  0x18   : > { %331 = sbr.rel (%p1300_p11) target bundleno = 40 (0x28), region = 36 }
  0x19   : > { %1954 = sst [smem:[#allocation12_spill]] %s1745_s12 }
  0x1d   : > { %367 = sbr.rel (!%p1725_p3) target bundleno = 40 (0x28), region = 56  ;;  %s369_s21 = sand.u32 (%p1725_p3), 1, %s1589_s15  }
  0x1e   : > { %s1302_s22 = sshll.u32 (%p1725_p3), %s1605_s19, 2  ;;  %s1301_s23 = sshll.u32 (%p1725_p3), %s369_s21, 3 }
  0x1f   : > { %s373_s13 = sadd.s32 (%p1725_p3), %s1601_s18, %s1302_s22  ;;  %s1955_s4 = sld [smem:[#allocation13_spill]] (%p1725_p3) }
  0x20   : > { %s1303_s28 = sshll.u32 (%p1725_p3), %s373_s13, 2  ;;  %s371_s30 = scalar_lea.vmem (%p1725_p3), [#allocation2], %s1301_s23 }
  0x25   : > { %s375_s29 = scalar_lea.vmem %s1955_s4, %s1303_s28 }
  0x26   : > { %v392_v0 = vld [vmem:[%s375_s29] sm:$0xf]  ;;  %v394_v1 = vld [vmem:[%s375_s29 + $0x8] sm:$0xf] }
  0x27   : > { %393 = vst [vmem:[%s371_s30] sm:$0xf] %v392_v0  ;;  %395 = vst [vmem:[%s371_s30 + $0x4] sm:$0xf] %v394_v1 }
  0x28 PF: > { %p1304_p12 = scmp.ge.s32.totalorder %s1609_s20, 1  ;;  %p422_p13 = scmp.lt.s32.totalorder %s1609_s20, 5 }
  0x2a   : > { %p423_p0 = pnand %p1304_p12, %p422_p13 }
  0x2b   : > { %p487_p1 = scmp.lt.s32.totalorder (!%p423_p0), %s1597_s17, 1  ;;  %p489_p2 = scmp.lt.s32.totalorder (!%p423_p0), %s1593_s16, 1 }
  0x2c   : > { %426 = sbr.rel (%p423_p0) target bundleno = 1018 (0x3fa), region = 97  ;;  %s1344_s21 = sshll.u32 (!%p423_p0), %s1597_s17, 3 }
  0x2d   : > { %s1157_s22 = sadd.s32 (!%p423_p0), %s1593_s16, %s1344_s21 }
  0x2e   : > { %s1345_s30 = sshll.u32 (!%p423_p0), %s1157_s22, 7 }
  0x31   : > { %v1611_v2 = vmov 0.0   ;;  %vm1612_vm0 = vmmov 0   ;;  %s1763_s13 = scalar_select %p487_p1, %s1597_s17, 1  ;;  %v1613_v3 = vmov 0   ;;  %vm519_vm1 = vcmask 1042432   ;;  %v779_v7 = vld [vmem:[%s1934_s7 + $0x30] sm:$0xff] }
  0x32   : > { %1371 = vmatprep.subr.mxu1 %v1611_v2  ;;  %1373 = vmatprep.mubr.msk.f32.mxu1 %vm1612_vm0, %v1611_v2  ;;  %s490_s23 = scalar_select %p489_p2, %s1593_s16, 1  ;;  %vm532_vm2 = vcmask 23552   ;;  %v778_v10 = vld [vmem:[%s1934_s7 + $0x28] sm:$0xff]  ;;  %v776_v11 = vld [vmem:[%s1934_s7 + $0x18] sm:$0xff]  ;;  %vm695_vm3 = vcmask 64512   ;;  %v611_v29 = vlaneseq  ;;  %vm702_vm10 = vcmask 1043456  }
  0x33   : > { %1494 = vset.pattern.permute.xlu0 %v1613_v3  ;;  %1495 = vset.pattern.permute.xlu1 %v1613_v3  ;;  %s1307_s24 = sshll.u32 %s1763_s13, 1  ;;  %s1309_s28 = sshll.u32 %s1763_s13, 3  ;;  %v774_v12 = vld [vmem:[%s1934_s7 + $0x8] sm:$0xff]  ;;  %v1046_v14 = vld [vmem:[%s1936_s9 + $0x18] sm:$0xff]  ;;  %vm905_vm11 = vcmask 130048   ;;  %vm801_vm12 = vcmask 261120  }
  0x34   : > { %s492_s26 = sadd.s32 %s1307_s24, %s490_s23  ;;  %s498_s25 = scalar_lea.vmem %s1928_s1, %s1309_s28  ;;  %v1044_v13 = vld [vmem:[%s1936_s9 + $0x8] sm:$0xff]  ;;  %v612_v32 = vshrl.u32 %v611_v29, 7  ;;  %vm1081_vm13 = vcmask 523264  }
  0x35   : > { %s1308_s11 = sshll.u32 %s492_s26, 2  ;;  %v510_v4 = vld [vmem:[%s498_s25] sm:$0xff]  ;;  %s502_s12 = scalar_lea.vmem %s1929_s2, %s1309_s28 }
  0x36   : > { %s494_s4 = scalar_lea.vmem %s1927_s0, %s1308_s11  ;;  %v511_v6 = vld [vmem:[%s502_s12] sm:$0xff]  ;;  %s1348_s29 = sshll.u32 %s1763_s13, 4  ;;  %v613_v35 = vcvt.s32.f32 %v612_v32 }
  0x37   : > { %v509_v5 = vld [vmem:[%s494_s4] sm:$0x7]  ;;  %529 = vperm.xlu0 %1494, %v511_v6   ;;  %s1799_s24 = scalar_lea.vmem %s1930_s3, %s1348_s29  ;;  %s1809_s13 = sand.u32 1, %s1585_s14  }
  0x38   : > { %v518_v8 = vmul.f32 %v509_v5, %v509_v5  ;;  %1372 = vmatpush3.msk.msra.mxu1 %vm519_vm1, %v509_v5  ;;  %v1496_v17 = vld [vmem:[%s1799_s24] sm:$0xff]   ;;  %v1497_v29 = vld [vmem:[%s1799_s24 + $0x8] sm:$0xff]   ;;  %s1305_s26 = sshll.u32 %s1809_s13, 3  ;;  %s1306_s28 = sshll.u32 %s1809_s13, 5 }
  0x39   : > { %1374 = vmatmul.mubr.msk.f32.vlgmr.msra.gmra.mxu1 %vm532_vm2, %v510_v4  ;;  %s431_s11 = scalar_lea.vmem [#allocation2], %s1305_s26  ;;  %v1501_v32 = vld [vmem:[%s1933_s6] sm:$0xff]   ;;  %s486_s25 = scalar_lea.vmem [#allocation3], %s1306_s28 }
  0x3a   : > { %v520_v9 = vsel %vm519_vm1, %v518_v8, 0.0  ;;  %1378 = vmatprep.mubr.msk.bf16.mxu1 %vm695_vm3, %v1496_v17  ;;  %1386 = vmatprep.mubr.msk.bf16.mxu0 %vm801_vm12, %v1501_v32  ;;  %s1160_s29 = sshll.u32 %s486_s25, 4  ;;  %s1874_s23 = scalar_lea.hbm %s1937_s10, %s1345_s30  ;;  %s1869_s29 = int_to_ptr.vmem [resolvable:$true] %s1160_s29 }
  0x3b   : > { %1015 = vperm.xlu0 %1494, %v779_v7   ;;  %v521_v15 = vrot.slane %v520_v9, 4  ;;  %s1146_s24 = scalar_lea.sflag [#allocation4], %s1809_s13  ;;  %s1517_s26 = scalar_lea.vmem %s1869_s29, 512 }
  0x3c   : > { %p1518_p3 = scmp.ne.s32.totalorder %s1869_s29, %s1517_s26 }
  0x3d   : > { %v522_v16 = vadd.f32 %v521_v15, %v520_v9 }
  0x3e   : > { %p1519_p4 = pnand %p1518_p3, %p1733_p8 }
  0x3f   : > { %1010 = vperm.xlu0 %1494, %v778_v10   ;;  %v523_v18 = vrot.slane %v522_v16, 2 }
  0x40   : > { %p1520_p5 = pneg %p1519_p4 }
  0x41   : > { %v524_v19 = vadd.f32 %v523_v18, %v522_v16 }
  0x43   : > { %1000 = vperm.xlu0 %1494, %v776_v11   ;;  %v525_v20 = vrot.slane %v524_v19, 1 }
  0x45   : > { %v526_v21 = vadd.f32 %v525_v20, %v524_v19 }
  0x47   : > { %990 = vperm.xlu0 %1494, %v774_v12  }
  0x4b   : > { %1058 = vperm.xlu0 %1494, %v1044_v13  }
  0x4f   : > { %1068 = vperm.xlu0 %1494, %v1046_v14  }
  0xb2   : > { %v530_v22 = vpop.permute.xlu0 %529 }
  0xf9   : > { %v605_v23 = vpop.f32.mrf.mxu1 }
  0xfa   : > { %v606_v24 = vadd.f32 %v605_v23, %v530_v22 }
  0xfb   : > { %v1375_v25 = vpop.f32.mrf.mxu1 }
  0xfc   : > { %v609_v26 = vadd.f32 %v606_v24, %v526_v21 }
  0xfe   : > { %v610_v27 = vmax.f32 %v609_v26, 0.0 }
 0x100   : > { %v614_v28 = vrot.slane %v610_v27, 4 }
 0x102   : > { %v615_v30 = vmin.f32 %v610_v27, %v614_v28 }
 0x104   : > { %v616_v31 = vrot.slane %v615_v30, 2 }
 0x106   : > { %v617_v33 = vmin.f32 %v615_v30, %v616_v31  ;;  %v1499_v30 = vld [vmem:[%s1932_s5] sm:$0xff]   ;;  %v1500_v31 = vld [vmem:[%s1932_s5 + $0x8] sm:$0xff]  }
 0x108   : > { %v618_v34 = vrot.slane %v617_v33, 1 }
 0x10a   : > { %v619_v36 = vmin.f32 %v617_v33, %v618_v34  ;;  %v1503_v33 = vld [vmem:[%s1932_s5 + $0x10] sm:$0xff]   ;;  %v1504_v34 = vld [vmem:[%s1932_s5 + $0x18] sm:$0xff]  }
 0x10c   : > { %vm620_vm4 = vcmp.eq.f32.partialorder %v610_v27, %v619_v36  ;;  %v629_v37 = vadd.f32 1e-08, %v619_v36  ;;  %v777_v36 = vld [vmem:[%s1934_s7 + $0x20] sm:$0xff] }
 0x10d   : > { %v621_v38 = vsel %vm620_vm4, %v613_v35, 8.0 }
 0x10e   : > { %v622_v39 = vrot.slane %v621_v38, 4  ;;  %1509 = vrcp.f32 %v629_v37  ;;  %v775_v37 = vld [vmem:[%s1934_s7 + $0x10] sm:$0xff] }
 0x110   : > { %v623_v40 = vmin.f32 %v621_v38, %v622_v39  ;;  %v773_v38 = vld [vmem:[%s1934_s7] sm:$0xff] }
 0x111   : > { %v1043_v39 = vld [vmem:[%s1936_s9] sm:$0xff] }
 0x112   : > { %v624_v41 = vrot.slane %v623_v40, 2 }
 0x114   : > { %v625_v42 = vmin.f32 %v623_v40, %v624_v41  ;;  %v1045_v40 = vld [vmem:[%s1936_s9 + $0x10] sm:$0xff] }
 0x116   : > { %v626_v43 = vrot.slane %v625_v42, 1 }
 0x118   : > { %v627_v44 = vmin.f32 %v625_v42, %v626_v43 }
 0x11a   : > { %vm628_vm5 = vcmp.eq.f32.partialorder %v613_v35, %v627_v44 }
 0x11b   : > { %v1510_v45 = vpop.eup %1509  ;;  %v1315_v46 = vsel %vm628_vm5, 1.0, %v1611_v2  ;;  %v636_v47 = vsel %vm628_vm5, 1e+30, %v610_v27 }
 0x11c   : > { %v637_v48 = vrot.slane %v636_v47, 4  ;;  %v633_v49 = vmul.f32 %v1510_v45, %v1315_v46 }
 0x11e   : > { %v638_v50 = vmin.f32 %v636_v47, %v637_v48  ;;  %v1505_v48 = vld [vmem:[%s1933_s6 + $0x10] sm:$0xff]  }
 0x120   : > { %v639_v51 = vrot.slane %v638_v50, 2 }
 0x122   : > { %v640_v52 = vmin.f32 %v638_v50, %v639_v51  ;;  %v1507_v50 = vld [vmem:[%s1935_s8] sm:$0xff]  }
 0x124   : > { %v641_v53 = vrot.slane %v640_v52, 1 }
 0x126   : > { %v642_v54 = vmin.f32 %v640_v52, %v641_v53 }
 0x128   : > { %vm643_vm6 = vcmp.eq.f32.partialorder %v636_v47, %v642_v54  ;;  %v652_v55 = vadd.f32 1e-08, %v642_v54 }
 0x129   : > { %v644_v56 = vsel %vm643_vm6, %v613_v35, 8.0 }
 0x12a   : > { %v645_v57 = vrot.slane %v644_v56, 4  ;;  %1511 = vrcp.f32 %v652_v55 }
 0x12c   : > { %v646_v58 = vmin.f32 %v644_v56, %v645_v57  ;;  %v1016_v56 = vpop.permute.xlu0 %1015 }
 0x12e   : > { %v647_v59 = vrot.slane %v646_v58, 2 }
 0x130   : > { %v648_v60 = vmin.f32 %v646_v58, %v647_v59 }
 0x132   : > { %v649_v61 = vrot.slane %v648_v60, 1 }
 0x134   : > { %v650_v62 = vmin.f32 %v648_v60, %v649_v61 }
 0x136   : > { %vm651_vm7 = vcmp.eq.f32.partialorder %v613_v35, %v650_v62 }
 0x137   : > { %v1512_v63 = vpop.eup %1511  ;;  %v659_v0 = vsel %vm651_vm7, 1e+30, %v636_v47  ;;  %v1316_v1 = vsel %vm651_vm7, 1.0, %v1611_v2  ;;  %v1502_v47 = vld [vmem:[%s1933_s6 + $0x8] sm:$0xff]  }
 0x138   : > { %v660_v3 = vrot.slane %v659_v0, 4  ;;  %v656_v4 = vmul.f32 %v1512_v63, %v1316_v1  ;;  %v658_v19 = vadd.f32 %v1512_v63, %v1510_v45  ;;  %v1011_v63 = vpop.permute.xlu0 %1010 }
 0x13a   : > { %v661_v5 = vmin.f32 %v659_v0, %v660_v3  ;;  %v657_v6 = vadd.f32 %v656_v4, %v633_v49  ;;  %v1506_v49 = vld [vmem:[%s1933_s6 + $0x18] sm:$0xff]  }
 0x13c   : > { %v662_v7 = vrot.slane %v661_v5, 2 }
 0x13e   : > { %v663_v8 = vmin.f32 %v661_v5, %v662_v7 }
 0x140   : > { %v664_v9 = vrot.slane %v663_v8, 1 }
 0x142   : > { %v665_v10 = vmin.f32 %v663_v8, %v664_v9  ;;  %v1001_v9 = vpop.permute.xlu0 %1000 }
 0x144   : > { %vm666_vm8 = vcmp.eq.f32.partialorder %v659_v0, %v665_v10  ;;  %v675_v11 = vadd.f32 1e-08, %v665_v10 }
 0x145   : > { %v667_v12 = vsel %vm666_vm8, %v613_v35, 8.0 }
 0x146   : > { %v668_v13 = vrot.slane %v667_v12, 4  ;;  %1513 = vrcp.f32 %v675_v11 }
 0x148   : > { %v669_v14 = vmin.f32 %v667_v12, %v668_v13 }
 0x14a   : > { %v670_v15 = vrot.slane %v669_v14, 2 }
 0x14c   : > { %v671_v16 = vmin.f32 %v669_v14, %v670_v15 }
 0x14e   : > { %v672_v17 = vrot.slane %v671_v16, 1 }
 0x150   : > { %v673_v18 = vmin.f32 %v671_v16, %v672_v17 }
 0x152   : > { %vm674_vm9 = vcmp.eq.f32.partialorder %v613_v35, %v673_v18  ;;  %v780_v35 = vld [vmem:[%s1934_s7 + $0x38] sm:$0xff] }
 0x153   : > { %v1514_v20 = vpop.eup %1513  ;;  %v1317_v21 = vsel %vm674_vm9, 1.0, %v1611_v2  ;;  %v1498_v2 = vld [vmem:[%s431_s11] sm:$0xff]   ;;  %1020 = vperm.xlu1 %1495, %v780_v35   ;;  %s1614_s11 = smov [#allocation3]  }
 0x154   : > { %v679_v22 = vmul.f32 %v1514_v20, %v1317_v21  ;;  %v681_v23 = vadd.f32 %v1514_v20, %v658_v19  ;;  %s1521_s18 = sshll.u32 %s1614_s11, 4  ;;  %s1522_s18 = int_to_ptr.vmem [resolvable:$false] %s1521_s18 }
 0x155   : > { %s1523_s19 = scalar_lea.vmem %s1522_s18, 1024  ;;  %p1524_p6 = scmp.lt.s32.totalorder %s1869_s29, %s1522_s18 }
 0x156   : > { %v680_v24 = vadd.f32 %v679_v22, %v657_v6  ;;  %1515 = vrcp.f32 %v681_v23  ;;  %p1525_p7 = scmp.lt.s32.totalorder %s1523_s19, %s1517_s26 }
 0x157   : > { %1005 = vperm.xlu1 %1495, %v777_v36  }
 0x158   : > { %p1526_p10 = por %p1525_p7, %p1524_p6 }
 0x15a   : > { %p1527_p11 = pnand %p1526_p10, %p1520_p5 }
 0x15b   : > { %995 = vperm.xlu1 %1495, %v775_v37  }
 0x15f   : > { %985 = vperm.xlu1 %1495, %v773_v38  }
 0x163   : > { %v1516_v25 = vpop.eup %1515  ;;  %1053 = vperm.xlu1 %1495, %v1043_v39   ;;  %v1508_v39 = vld [vmem:[%s1935_s8 + $0x8] sm:$0xff]  }
 0x164   : > { %v683_v26 = vmul.f32 %v1516_v25, %v680_v24 }
 0x166   : > { %v684_v27 = vpack.c.bf16 %v683_v26, %v683_v26 }
 0x167   : > { %1063 = vperm.xlu1 %1495, %v1045_v40  }
 0x168   : > { %1416 = vmatprep.subr.msk.bf16.mxu1 %vm702_vm10, %v684_v27  ;;  %v704_v28 = vsel %vm702_vm10, %v684_v27, 0 }
 0x169   : > { %1377 = vmatpush3.bf16.msra.mxu1 %v704_v28 }
 0x16a   : > { %1394 = vmatprep.subr.bf16.mxu1 %v1498_v2 }
 0x16c   : > { %1379 = vmatmul.mubr.msk.bf16.vlgmr.msra.gmra.mxu1 %vm695_vm3, %v1497_v29  ;;  %v991_v29 = vpop.permute.xlu0 %990 }
 0x16d   : > { %1395 = vmatpush3.bf16.msra.mxu1 %v1498_v2  ;;  %1396 = vmatprep.mubr.msk.bf16.mxu1 %vm905_vm11, %v1499_v30 }
 0x174   : > { %1397 = vmatmul.mubr.msk.bf16.vlgmr.msra.gmra.mxu1 %vm905_vm11, %v1500_v31 }
 0x175   : > { %1400 = vmatprep.mubr.msk.bf16.mxu1 %vm905_vm11, %v1503_v33 }
 0x17c   : > { %1401 = vmatmul.mubr.msk.bf16.gmra.mxu1 %vm905_vm11, %v1504_v34 }
 0x1ce   : > { %v1021_v57 = vpop.permute.xlu1 %1020 }
 0x1d2   : > { %v1006_v0 = vpop.permute.xlu1 %1005 }
 0x1d6   : > { %v996_v10 = vpop.permute.xlu1 %995 }
 0x1da   : > { %v986_v2 = vpop.permute.xlu1 %985 }
 0x1de   : > { %v1054_v40 = vpop.permute.xlu1 %1053 }
 0x22c   : > { %v1380_v41 = vpop.f32.mrf.mxu1 }
 0x22e   : > { %v740_v42 = vpop.f32.mrf.mxu1 }
 0x230   : > { %v1381_v43 = vpop.f32.mrf.mxu1 }
 0x231   : > { %v756_v44 = vpack.c.bf16 %v1381_v43, %v1380_v41  ;;  %v1059_v41 = vpop.permute.xlu0 %1058 }
 0x232   : > { %v743_v45 = vpop.f32.mrf.mxu1 }
 0x233   : > { %v755_v46 = vpack.c.bf16 %v743_v45, %v740_v42  ;;  %1382 = vmatprep.subr.bf16.mxu0 %v756_v44  ;;  %v1064_v42 = vpop.permute.xlu1 %1063 }
 0x234   : > { %1383 = vmatpush3.bf16.msra.mxu0 %v756_v44  ;;  %v1398_v51 = vpop.f32.mrf.mxu1 }
 0x235   : > { %1384 = vmatprep.subr.bf16.mxu0 %v755_v46 }
 0x236   : > { %v952_v52 = vpop.f32.mrf.mxu1 }
 0x238   : > { %1385 = vmatpush3.bf16.msra.mxu0 %v755_v46  ;;  %v1399_v53 = vpop.f32.mrf.mxu1 }
 0x23a   : > { %v955_v54 = vpop.f32.mrf.mxu1 }
 0x23b   : > { %1387 = vmatmul.mubr.msk.bf16.vlgmr.msra.gmra.mxu0 %vm801_vm12, %v1502_v47 }
 0x23c   : > { %1390 = vmatprep.mubr.msk.bf16.mxu0 %vm801_vm12, %v1505_v48  ;;  %v1402_v59 = vpop.f32.mrf.mxu1  ;;  %v1069_v48 = vpop.permute.xlu0 %1068 }
 0x23e   : > { %v968_v61 = vpop.f32.mrf.mxu1 }
 0x240   : > { %v1403_v4 = vpop.f32.mrf.mxu1 }
 0x242   : > { %v971_v14 = vpop.f32.mrf.mxu1 }
 0x243   : > { %1391 = vmatmul.mubr.msk.bf16.gmra.mxu0 %vm801_vm12, %v1506_v49 }
 0x244   : > { %1412 = vmatprep.mubr.msk.bf16.mxu0 %vm1081_vm13, %v1507_v50 }
 0x2fb   : > { %v1388_v55 = vpop.f32.mrf.mxu0 }
 0x2fc   : > { %v961_v13 = vadd.f32 %v1398_v51, %v1388_v55 }
 0x2fd   : > { %v848_v58 = vpop.f32.mrf.mxu0 }
 0x2fe   : > { %v1025_v24 = vadd.f32 %v996_v10, %v961_v13  ;;  %v953_v25 = vadd.f32 %v952_v52, %v848_v58 }
 0x2ff   : > { %v1389_v60 = vpop.f32.mrf.mxu0 }
 0x300   : > { %v964_v7 = vadd.f32 %v1399_v53, %v1389_v60  ;;  %v1033_v33 = vmax.f32 %v1025_v24, 0.0  ;;  %v1023_v34 = vadd.f32 %v986_v2, %v953_v25 }
 0x301   : > { %v851_v62 = vpop.f32.mrf.mxu0 }
 0x302   : > { %v1026_v19 = vadd.f32 %v1001_v9, %v964_v7  ;;  %v956_v20 = vadd.f32 %v955_v54, %v851_v62  ;;  %v1031_v37 = vmax.f32 %v1023_v34, 0.0 }
 0x303   : > { %v1392_v1 = vpop.f32.mrf.mxu0 }
 0x304   : > { %v977_v3 = vadd.f32 %v1402_v59, %v1392_v1  ;;  %v1034_v30 = vmax.f32 %v1026_v19, 0.0  ;;  %v1024_v31 = vadd.f32 %v991_v29, %v956_v20 }
 0x305   : > { %v864_v5 = vpop.f32.mrf.mxu0 }
 0x306   : > { %v969_v6 = vadd.f32 %v968_v61, %v864_v5  ;;  %v1029_v11 = vadd.f32 %v1016_v56, %v977_v3  ;;  %v1032_v35 = vmax.f32 %v1024_v31, 0.0  ;;  %v1048_v36 = vpack.c.bf16 %v1034_v30, %v1033_v33 }
 0x307   : > { %v1393_v8 = vpop.f32.mrf.mxu0 }
 0x308   : > { %v980_v12 = vadd.f32 %v1403_v4, %v1393_v8  ;;  %v1027_v16 = vadd.f32 %v1006_v0, %v969_v6  ;;  %v1037_v21 = vmax.f32 %v1029_v11, 0.0  ;;  %v1047_v38 = vpack.c.bf16 %v1032_v35, %v1031_v37 }
 0x309   : > { %v867_v15 = vpop.f32.mrf.mxu0 }
 0x30a   : > { %v1030_v17 = vadd.f32 %v1021_v57, %v980_v12  ;;  %v972_v18 = vadd.f32 %v971_v14, %v867_v15  ;;  %v1035_v26 = vmax.f32 %v1027_v16, 0.0 }
 0x30c   : > { %v1038_v22 = vmax.f32 %v1030_v17, 0.0  ;;  %v1028_v23 = vadd.f32 %v1011_v63, %v972_v18 }
 0x30e   : > { %v1036_v27 = vmax.f32 %v1028_v23, 0.0  ;;  %v1050_v28 = vpack.c.bf16 %v1038_v22, %v1037_v21 }
 0x310   : > { %1404 = vmatprep.subr.bf16.mxu0 %v1050_v28  ;;  %v1049_v32 = vpack.c.bf16 %v1036_v27, %v1035_v26 }
 0x311   : > { %1405 = vmatpush3.bf16.msra.mxu0 %v1050_v28 }
 0x312   : > { %1406 = vmatprep.subr.bf16.mxu0 %v1049_v32 }
 0x315   : > { %1407 = vmatpush3.bf16.msra.mxu0 %v1049_v32 }
 0x316   : > { %1408 = vmatprep.subr.bf16.mxu0 %v1048_v36 }
 0x319   : > { %1409 = vmatpush3.bf16.msra.mxu0 %v1048_v36 }
 0x31a   : > { %1410 = vmatprep.subr.bf16.mxu0 %v1047_v38 }
 0x31d   : > { %1411 = vmatpush3.bf16.msra.mxu0 %v1047_v38 }
 0x320   : > { %1413 = vmatmul.mubr.msk.bf16.vlgmr.msra.gmra.mxu0 %vm1081_vm13, %v1508_v39 }
 0x3e0   : > { %v1414_v43 = vpop.f32.mrf.mxu0 }
 0x3e1   : > { %v1131_v44 = vadd.f32 %v1414_v43, %v1064_v42 }
 0x3e2   : > { %v1122_v45 = vpop.f32.mrf.mxu0 }
 0x3e3   : > { %v1139_v46 = vmax.f32 %v1131_v44, 0.0  ;;  %v1123_v47 = vadd.f32 %v1122_v45, %v1054_v40 }
 0x3e4   : > { %v1415_v49 = vpop.f32.mrf.mxu0 }
 0x3e5   : > { %1143 = vst [vmem:[%s486_s25 + $0x10] sm:$0xff] %v1139_v46  ;;  %v1137_v50 = vmax.f32 %v1123_v47, 0.0  ;;  %v1134_v51 = vadd.f32 %v1415_v49, %v1069_v48 }
 0x3e6   : > { %v1125_v52 = vpop.f32.mrf.mxu0 }
 0x3e7   : > { %1141 = vst [vmem:[%s486_s25] sm:$0xff] %v1137_v50  ;;  %v1140_v53 = vmax.f32 %v1134_v51, 0.0  ;;  %v1126_v54 = vadd.f32 %v1125_v52, %v1059_v41 }
 0x3e9   : > { %1144 = vst [vmem:[%s486_s25 + $0x18] sm:$0xff] %v1140_v53  ;;  %v1138_v55 = vmax.f32 %v1126_v54, 0.0 }
 0x3eb   : > { %1142 = vst [vmem:[%s486_s25 + $0x8] sm:$0xff] %v1138_v55 }
 0x3ec   : > { %1530 = shalt.err (!%p1527_p11)
}
 0x3ed   : > { %s1531_s4 = scalar_lea.hbm %s1874_s23, 512  ;;  %s1535_s21 = scalar_lea.hbm %s1937_s10, 2048 }
 0x3ee   : > { %p1532_p12 = scmp.ne.s32.totalorder %s1874_s23, %s1531_s4  ;;  %p1536_p1 = scmp.lt.s32.totalorder %s1874_s23, %s1937_s10 }
 0x3ef   : > { %p1537_p2 = scmp.lt.s32.totalorder %s1535_s21, %s1531_s4 }
 0x3f0   : > { %p1533_p13 = pnand %p1532_p12, %p1733_p8 }
 0x3f1   : > { %p1538_p3 = por %p1537_p2, %p1536_p1 }
 0x3f2   : > { %p1534_p0 = pneg %p1533_p13 }
 0x3f4   : > { %p1539_p4 = pnand %p1538_p3, %p1534_p0 }
 0x3f6   : > { %1542 = shalt.err (!%p1539_p4)
}
 0x3f7   : > { %s1615_s30 = smov 128   ;;  %s1616_s16 = smov 256  }
 0x3f8   : > { %s1617_s17 = smov 8  }
 0x3f9   : > { %1417 = dma.vmem_to_hbm [thread:$0]  (%p1733_p8), %s1869_s29, 512, %s1874_s23, %s1146_s24, %s1615_s30, %s1616_s16, %s1617_s17  }
 0x3fa PF: > { %s1956_s26 = sld [smem:[#allocation6_spill]]  ;;  %p1423_p5 = scmp.ge.s32.totalorder %s1609_s20, 2 }
 0x3fc   : > { %p1420_p6 = pnand %p1423_p5, %p1737_p9 }
 0x3fe   : > { %p1421_p7 = pneg %p1420_p6 }
 0x400   : > { %s1175_s18 = sand.u32 1, %s1956_s26  }
 0x401   : > { %s1176_s19 = scalar_lea.sflag [#allocation4], %s1175_s18 }
 0x402   : > { %1576 = dma.done.wait (%p1421_p7), %s1176_s19, 512  }
 0x403   : > { %1578 = vsyncadd (%p1421_p7), %s1176_s19, 4294966784  ;;  %s23_s20 = sadd.s32 1, %s1609_s20   ;;  %s1958_s27 = sld [smem:[#allocation12_spill]] }
 0x404   : > { %p20_p10 = scmp.ge.s32.totalorder %s23_s20, 6   ;;  %s1959_s16 = sld [smem:[#allocation7_spill]] }
 0x405   : > { %s1960_s17 = sld [smem:[#allocation8_spill]]  ;;  %s1963_s13 = smov %s1585_s14 }
 0x406   : > { %s1961_s18 = sld [smem:[#allocation9_spill]]  ;;  %s1964_s14 = smov %s1589_s15 }
 0x407   : > { %s1962_s19 = sld [smem:[#allocation10_spill]]  ;;  %22 = sbr.rel (!%p20_p10) target bundleno = 7 (0x7), region = 153 }
 0x409   : > { %s1965_s15 = smov %s1958_s27 }
 0x40c   :  { %1181 = vsyncpa [#allocation4], 1 }
 0x40d   :  { %1183 = vsyncpa [#allocation4 + $0x1], 1 }

</bundles_post_ra>
